<compile_context>
chip_gen: v7x
topology: tpu7x:2x2x1
jax: 0.10.0
libtpu: 0.0.40
codegen_flags: <defaults>
</compile_context>

<pallas_src>
import math

import jax
import jax.numpy as jnp
from jax.experimental import pallas as pl
from jax.experimental.pallas import tpu as pltpu

IN_CHANNELS = 22
BN_EPS = 1e-5
_INV_SQRT2 = 1.0 / math.sqrt(2.0)
_SQRT_2_OVER_PI = math.sqrt(2.0 / math.pi)


def _pick_tile(dim, base, max_tile):
    """Largest multiple of `base` that divides `dim` and is <= max_tile,
    else the full dim (full-extent blocks are always legal)."""
    if dim % base != 0:
        return dim
    best = base
    t = base
    while t <= min(dim, max_tile):
        if dim % t == 0:
            best = t
        t += base
    return best


def _scalar_f32(v):
    return jnp.asarray(v, jnp.float32).reshape(())


# --------------------------------------------------------------------------
# Pass 1: Conv1d(k=1) channel reduction + global-stat accumulation
# --------------------------------------------------------------------------
def _conv_stats_kernel(w_ref, x_ref, y_ref, sum_ref, ssq_ref):
    # w_ref  : (22,) SMEM        -- conv weights (bias dropped; cancels in BN)
    # x_ref  : (tb, 22, tl) VMEM -- x tile (source dtype)
    # y_ref  : (tb, tl)     VMEM -- conv output tile (y dtype)
    # sum_ref: (1, 8, tl)   VMEM -- resident per-batch-tile accumulator (f32)
    # ssq_ref: (1, 8, tl)   VMEM -- resident per-batch-tile accumulator (f32)
    j = pl.program_id(1)

    @pl.when(j == 0)
    def _():
        sum_ref[...] = jnp.zeros_like(sum_ref)
        ssq_ref[...] = jnp.zeros_like(ssq_ref)

    # Unrolled scalar-broadcast FMA over the 22 channels (VPU only; no MXU/XLU
    # for a 22-wide reduce -- pass 1 is HBM-bound on all generations).
    # TODO(synk): on v7x + bf16 inputs, check bundles; if vld/cast binds,
    #             process channels in packed bf16 pairs.
    acc = x_ref[:, 0, :].astype(jnp.float32) * w_ref[0]
    for c in range(1, IN_CHANNELS):
        acc = acc + x_ref[:, c, :].astype(jnp.float32) * w_ref[c]

    y_ref[...] = acc.astype(y_ref.dtype)

    tl = acc.shape[-1]
    partial = jnp.sum(acc, axis=0, keepdims=True)            # (1, tl) f32
    partial_sq = jnp.sum(acc * acc, axis=0, keepdims=True)   # (1, tl) f32
    # Park the partials in sublane row 0 of the 8-row accumulator block
    # (8 rows keep the block sublane-aligned; rows 1..7 stay zero).
    row = jax.lax.broadcasted_iota(jnp.int32, (8, tl), 0)
    sum_ref[0] = sum_ref[0] + jnp.where(row == 0, partial, 0.0)
    ssq_ref[0] = ssq_ref[0] + jnp.where(row == 0, partial_sq, 0.0)


# --------------------------------------------------------------------------
# Pass 2: BatchNorm affine (precomputed scale/shift) + GELU
# --------------------------------------------------------------------------
def _make_bn_gelu_kernel(approximate_gelu):
    def kernel(p_ref, y_ref, o_ref):
        # p_ref: (2,) SMEM -- [scale, shift] with scale = gamma*rsqrt(var+eps),
        #                     shift = beta - mean*scale
        scale = p_ref[0]
        shift = p_ref[1]
        z = y_ref[...].astype(jnp.float32) * scale + shift
        if approximate_gelu:
            # tanh form: transcendental lands in the EUP slot (v7x VALU relief)
            g = 0.5 * z * (1.0 + jnp.tanh(_SQRT_2_OVER_PI * (z + 0.044715 * z * z * z)))
        else:
            # exact erf form: matches PyTorch nn.GELU() default
            g = 0.5 * z * (1.0 + jax.lax.erf(z * _INV_SQRT2))
        o_ref[...] = g.astype(o_ref.dtype)
    return kernel


# --------------------------------------------------------------------------
# Wrapper
# --------------------------------------------------------------------------
def conv_channel_forward(x, conv_w, conv_b, bn_gamma, bn_beta,
                         bn_eps=BN_EPS, tb_max=16, tl_max=8192,
                         approximate_gelu=False):
    """x: (B, 22, L) float  ->  (B, 1, L) in x.dtype."""
    del conv_b  # NOTE: conv bias shifts the mean that train-mode BN subtracts;
                # it cancels exactly, so pass 1 omits it.
    B, C, L = x.shape
    assert C == IN_CHANNELS

    x_itemsize = jnp.dtype(x.dtype).itemsize
    y_dtype = x.dtype if x_itemsize <= 2 else jnp.float32
    y_itemsize = jnp.dtype(y_dtype).itemsize
    out_itemsize = x_itemsize

    # ---- tile selection under a VMEM data budget (fits v7x's 64 MiB) -------
    def _pass1_bytes(tb_, tl_):
        return (2 * tb_ * C * tl_ * x_itemsize      # x double-buffered
                + 2 * tb_ * tl_ * y_itemsize        # y out double-buffered
                + 2 * 2 * 8 * tl_ * 4)              # two (1,8,tl) f32 accumulators

    budget = 42 << 20
    tb_cap = max(tb_max, 8)
    tl_cap = max(tl_max, 128)
    tb = _pick_tile(B, 8, tb_cap)
    tl = _pick_tile(L, 128, tl_cap)
    while _pass1_bytes(tb, tl) > budget and tl_cap > 128:
        tl_cap //= 2
        tl = _pick_tile(L, 128, tl_cap)
    while _pass1_bytes(tb, tl) > budget and tb_cap > 8:
        tb_cap //= 2
        tb = _pick_tile(B, 8, tb_cap)
    nb = B // tb
    nl = L // tl

    headroom = 4 << 20
    vmem1 = int(max(16 << 20, _pass1_bytes(tb, tl) + headroom))
    vmem2 = int(max(16 << 20,
                    2 * tb * tl * (y_itemsize + out_itemsize) + headroom))

    # ---- pass 1: conv channel-reduce + stat partials ------------------------
    params1 = jnp.asarray(conv_w, jnp.float32).reshape(-1)   # (22,)

    cost1 = pl.CostEstimate(
        flops=2 * B * C * L + 4 * B * L,
        transcendentals=0,
        bytes_accessed=B * C * L * x_itemsize + B * L * y_itemsize
                       + 2 * nb * 8 * tl * 4,
    )

    y, psum, pssq = pl.pallas_call(
        _conv_stats_kernel,
        grid=(nb, nl),
        in_specs=[
            pl.BlockSpec(memory_space=pltpu.MemorySpace.SMEM),       # conv weights
            pl.BlockSpec((tb, C, tl), lambda i, j: (i, 0, j)),       # x tile
        ],
        out_specs=[
            pl.BlockSpec((tb, tl), lambda i, j: (i, j)),             # y tile
            pl.BlockSpec((1, 8, tl), lambda i, j: (i, 0, 0)),        # sum acc (per i)
            pl.BlockSpec((1, 8, tl), lambda i, j: (i, 0, 0)),        # sumsq acc (per i)
        ],
        out_shape=[
            jax.ShapeDtypeStruct((B, L), y_dtype),
            jax.ShapeDtypeStruct((nb, 8, tl), jnp.float32),
            jax.ShapeDtypeStruct((nb, 8, tl), jnp.float32),
        ],
        compiler_params=pltpu.CompilerParams(
            dimension_semantics=("parallel", "arbitrary"),
            vmem_limit_bytes=vmem1),
        cost_estimate=cost1,
    )(params1, x)

    # ---- finish global BatchNorm statistics on the tiny partials -----------
    n = jnp.float32(B * L)
    mean = jnp.sum(psum) / n
    var = jnp.maximum(jnp.sum(pssq) / n - mean * mean, 0.0)   # biased variance
    inv_std = jax.lax.rsqrt(var + jnp.float32(bn_eps))
    scale = _scalar_f32(bn_gamma) * inv_std
    shift = _scalar_f32(bn_beta) - mean * scale
    params2 = jnp.stack([scale, shift])

    # ---- pass 2: BN affine + GELU -------------------------------------------
    cost2 = pl.CostEstimate(
        flops=8 * B * L,
        transcendentals=B * L,
        bytes_accessed=B * L * y_itemsize + B * L * out_itemsize,
    )

    out = pl.pallas_call(
        _make_bn_gelu_kernel(approximate_gelu),
        grid=(nb, nl),
        in_specs=[
            pl.BlockSpec(memory_space=pltpu.MemorySpace.SMEM),       # scale/shift
            pl.BlockSpec((tb, tl), lambda i, j: (i, j)),             # y tile
        ],
        out_specs=pl.BlockSpec((tb, tl), lambda i, j: (i, j)),
        out_shape=jax.ShapeDtypeStruct((B, L), x.dtype),
        compiler_params=pltpu.CompilerParams(
            dimension_semantics=("parallel", "parallel"),
            vmem_limit_bytes=vmem2),
        cost_estimate=cost2,
    )(params2, y)

    return out.reshape(B, 1, L)


# --------------------------------------------------------------------------
# Pure-JAX reference (for sanity checking)
# --------------------------------------------------------------------------
def _reference(x, conv_w, conv_b, bn_gamma, bn_beta, bn_eps=BN_EPS):
    xf = jnp.asarray(x, jnp.float32)
    w = jnp.asarray(conv_w, jnp.float32).reshape(-1)
    y = jnp.einsum("bcl,c->bl", xf, w) + jnp.asarray(conv_b, jnp.float32).reshape(())
    mean = jnp.mean(y)
    var = jnp.mean((y - mean) ** 2)
    z = bn_gamma * (y - mean) / jnp.sqrt(var + bn_eps) + bn_beta
    g = 0.5 * z * (1.0 + jax.lax.erf(z * _INV_SQRT2))
    return g[:, None, :].astype(x.dtype)


if __name__ == "__main__":
    key = jax.random.PRNGKey(0)
    k_x, k_w, k_b, k_x2, k_x3 = jax.random.split(key, 5)

    bound = 1.0 / math.sqrt(IN_CHANNELS)          # Conv1d default init range
    conv_w = jax.random.uniform(k_w, (1, IN_CHANNELS, 1), jnp.float32, -bound, bound)
    conv_b = jax.random.uniform(k_b, (), jnp.float32, -bound, bound)
    bn_gamma = jnp.float32(1.0)                   # BatchNorm1d default affine init
    bn_beta = jnp.float32(0.0)

    # --- small shape consistent with the module (B, C=22, L) ----------------
    B, C, L = 2, IN_CHANNELS, 16
    x = jax.random.normal(k_x, (B, C, L), dtype=jnp.float32)
    out = conv_channel_forward(x, conv_w, conv_b, bn_gamma, bn_beta)
    out = jax.block_until_ready(out)
    ref = _reference(x, conv_w, conv_b, bn_gamma, bn_beta)
    assert out.shape == (B, 1, L)
    assert jnp.allclose(out, ref, atol=1e-4, rtol=1e-4)

    # --- multi-tile grid: exercises per-batch-tile accumulators (2x2 grid) ---
    B2, L2 = 16, 256
    x2 = jax.random.normal(k_x2, (B2, C, L2), dtype=jnp.float32)
    out2 = conv_channel_forward(x2, conv_w, conv_b, bn_gamma, bn_beta,
                                tb_max=8, tl_max=128)     # grid = (2, 2)
    out2 = jax.block_until_ready(out2)
    ref2 = _reference(x2, conv_w, conv_b, bn_gamma, bn_beta)
    assert out2.shape == (B2, 1, L2)
    assert jnp.allclose(out2, ref2, atol=1e-4, rtol=1e-4)

    # --- bf16 input: exercises the reduced-precision intermediate-y path -----
    B3, L3 = 8, 256
    x3 = jax.random.normal(k_x3, (B3, C, L3), dtype=jnp.bfloat16)
    out3 = conv_channel_forward(x3, conv_w, conv_b, bn_gamma, bn_beta)
    out3 = jax.block_until_ready(out3)
    ref3 = _reference(x3, conv_w, conv_b, bn_gamma, bn_beta)
    assert out3.shape == (B3, 1, L3)
    assert out3.dtype == jnp.bfloat16
    assert jnp.allclose(out3.astype(jnp.float32), ref3.astype(jnp.float32),
                        atol=7.5e-2, rtol=7.5e-2)

    print("KERNEL_OK")
</pallas_src>

<mosaic_0001>
module attributes {stable_mosaic.version = 11 : i64} {
  func.func @_conv_stats_kernel(%arg0: i32, %arg1: i32, %arg2: memref<22xf32, #tpu.memory_space<smem>>, %arg3: memref<2x22x16xf32, #tpu.memory_space<vmem>>, %arg4: memref<2x16xf32, #tpu.memory_space<vmem>>, %arg5: memref<1x8x16xf32, #tpu.memory_space<vmem>>, %arg6: memref<1x8x16xf32, #tpu.memory_space<vmem>>) attributes {dimension_semantics = [#tpu.dimension_semantics<parallel>, #tpu.dimension_semantics<arbitrary>], iteration_bounds = array<i64: 1, 1>, scalar_prefetch = 0 : i64, scratch_operands = 0 : i64, tpu.core_type = #tpu.core_type<tc>, window_params = [{transform_indices = @transform_0, window_bounds = array<i64: 22>}, {transform_indices = @transform_1, window_bounds = array<i64: 2, 22, 16>}, {transform_indices = @transform_2, window_bounds = array<i64: 2, 16>}, {transform_indices = @transform_3, window_bounds = array<i64: 1, 8, 16>}, {transform_indices = @transform_4, window_bounds = array<i64: 1, 8, 16>}]} {
    %c0_i32 = arith.constant 0 : i32
    %0 = arith.cmpi eq, %arg1, %c0_i32 : i32
    %1 = arith.extui %0 : i1 to i32
    %c0_i32_0 = arith.constant 0 : i32
    %2 = arith.cmpi ne, %1, %c0_i32_0 : i32
    scf.if %2 {
      %cst_86 = arith.constant 0.000000e+00 : f32
      %165 = vector.broadcast %cst_86 : f32 to vector<1x8x16xf32>
      %c0_87 = arith.constant 0 : index
      %c0_88 = arith.constant 0 : index
      %c0_89 = arith.constant 0 : index
      %166 = vector.load %arg5[%c0_87, %c0_88, %c0_89] : memref<1x8x16xf32, #tpu.memory_space<vmem>>, vector<1x8x16xf32>
      tpu.vector_store %arg5[%c0_87, %c0_88, %c0_89], %165 {strides = array<i32>} : memref<1x8x16xf32, #tpu.memory_space<vmem>>, vector<1x8x16xf32>,
      %cst_90 = arith.constant 0.000000e+00 : f32
      %167 = vector.broadcast %cst_90 : f32 to vector<1x8x16xf32>
      %c0_91 = arith.constant 0 : index
      %c0_92 = arith.constant 0 : index
      %c0_93 = arith.constant 0 : index
      %168 = vector.load %arg6[%c0_91, %c0_92, %c0_93] : memref<1x8x16xf32, #tpu.memory_space<vmem>>, vector<1x8x16xf32>
      tpu.vector_store %arg6[%c0_91, %c0_92, %c0_93], %167 {strides = array<i32>} : memref<1x8x16xf32, #tpu.memory_space<vmem>>, vector<1x8x16xf32>,
    } else {
    }
    %c0 = arith.constant 0 : index
    %c0_1 = arith.constant 0 : index
    %c0_2 = arith.constant 0 : index
    %3 = vector.load %arg3[%c0, %c0_1, %c0_2] : memref<2x22x16xf32, #tpu.memory_space<vmem>>, vector<2x1x16xf32>
    %4 = vector.shape_cast %3 : vector<2x1x16xf32> to vector<2x16xf32>
    %c0_3 = arith.constant 0 : index
    %5 = memref.load %arg2[%c0_3] : memref<22xf32, #tpu.memory_space<smem>>
    %6 = vector.broadcast %5 : f32 to vector<2x16xf32>
    %7 = arith.mulf %4, %6 : vector<2x16xf32>
    %c0_4 = arith.constant 0 : index
    %c1 = arith.constant 1 : index
    %c0_5 = arith.constant 0 : index
    %8 = vector.load %arg3[%c0_4, %c1, %c0_5] : memref<2x22x16xf32, #tpu.memory_space<vmem>>, vector<2x1x16xf32>
    %9 = vector.shape_cast %8 : vector<2x1x16xf32> to vector<2x16xf32>
    %c1_6 = arith.constant 1 : index
    %10 = memref.load %arg2[%c1_6] : memref<22xf32, #tpu.memory_space<smem>>
    %11 = vector.broadcast %10 : f32 to vector<2x16xf32>
    %12 = arith.mulf %9, %11 : vector<2x16xf32>
    %13 = arith.addf %7, %12 : vector<2x16xf32>
    %c0_7 = arith.constant 0 : index
    %c2 = arith.constant 2 : index
    %c0_8 = arith.constant 0 : index
    %14 = vector.load %arg3[%c0_7, %c2, %c0_8] : memref<2x22x16xf32, #tpu.memory_space<vmem>>, vector<2x1x16xf32>
    %15 = vector.shape_cast %14 : vector<2x1x16xf32> to vector<2x16xf32>
    %c2_9 = arith.constant 2 : index
    %16 = memref.load %arg2[%c2_9] : memref<22xf32, #tpu.memory_space<smem>>
    %17 = vector.broadcast %16 : f32 to vector<2x16xf32>
    %18 = arith.mulf %15, %17 : vector<2x16xf32>
    %19 = arith.addf %13, %18 : vector<2x16xf32>
    %c0_10 = arith.constant 0 : index
    %c3 = arith.constant 3 : index
    %c0_11 = arith.constant 0 : index
    %20 = vector.load %arg3[%c0_10, %c3, %c0_11] : memref<2x22x16xf32, #tpu.memory_space<vmem>>, vector<2x1x16xf32>
    %21 = vector.shape_cast %20 : vector<2x1x16xf32> to vector<2x16xf32>
    %c3_12 = arith.constant 3 : index
    %22 = memref.load %arg2[%c3_12] : memref<22xf32, #tpu.memory_space<smem>>
    %23 = vector.broadcast %22 : f32 to vector<2x16xf32>
    %24 = arith.mulf %21, %23 : vector<2x16xf32>
    %25 = arith.addf %19, %24 : vector<2x16xf32>
    %c0_13 = arith.constant 0 : index
    %c4 = arith.constant 4 : index
    %c0_14 = arith.constant 0 : index
    %26 = vector.load %arg3[%c0_13, %c4, %c0_14] : memref<2x22x16xf32, #tpu.memory_space<vmem>>, vector<2x1x16xf32>
    %27 = vector.shape_cast %26 : vector<2x1x16xf32> to vector<2x16xf32>
    %c4_15 = arith.constant 4 : index
    %28 = memref.load %arg2[%c4_15] : memref<22xf32, #tpu.memory_space<smem>>
    %29 = vector.broadcast %28 : f32 to vector<2x16xf32>
    %30 = arith.mulf %27, %29 : vector<2x16xf32>
    %31 = arith.addf %25, %30 : vector<2x16xf32>
    %c0_16 = arith.constant 0 : index
    %c5 = arith.constant 5 : index
    %c0_17 = arith.constant 0 : index
    %32 = vector.load %arg3[%c0_16, %c5, %c0_17] : memref<2x22x16xf32, #tpu.memory_space<vmem>>, vector<2x1x16xf32>
    %33 = vector.shape_cast %32 : vector<2x1x16xf32> to vector<2x16xf32>
    %c5_18 = arith.constant 5 : index
    %34 = memref.load %arg2[%c5_18] : memref<22xf32, #tpu.memory_space<smem>>
    %35 = vector.broadcast %34 : f32 to vector<2x16xf32>
    %36 = arith.mulf %33, %35 : vector<2x16xf32>
    %37 = arith.addf %31, %36 : vector<2x16xf32>
    %c0_19 = arith.constant 0 : index
    %c6 = arith.constant 6 : index
    %c0_20 = arith.constant 0 : index
    %38 = vector.load %arg3[%c0_19, %c6, %c0_20] : memref<2x22x16xf32, #tpu.memory_space<vmem>>, vector<2x1x16xf32>
    %39 = vector.shape_cast %38 : vector<2x1x16xf32> to vector<2x16xf32>
    %c6_21 = arith.constant 6 : index
    %40 = memref.load %arg2[%c6_21] : memref<22xf32, #tpu.memory_space<smem>>
    %41 = vector.broadcast %40 : f32 to vector<2x16xf32>
    %42 = arith.mulf %39, %41 : vector<2x16xf32>
    %43 = arith.addf %37, %42 : vector<2x16xf32>
    %c0_22 = arith.constant 0 : index
    %c7 = arith.constant 7 : index
    %c0_23 = arith.constant 0 : index
    %44 = vector.load %arg3[%c0_22, %c7, %c0_23] : memref<2x22x16xf32, #tpu.memory_space<vmem>>, vector<2x1x16xf32>
    %45 = vector.shape_cast %44 : vector<2x1x16xf32> to vector<2x16xf32>
    %c7_24 = arith.constant 7 : index
    %46 = memref.load %arg2[%c7_24] : memref<22xf32, #tpu.memory_space<smem>>
    %47 = vector.broadcast %46 : f32 to vector<2x16xf32>
    %48 = arith.mulf %45, %47 : vector<2x16xf32>
    %49 = arith.addf %43, %48 : vector<2x16xf32>
    %c0_25 = arith.constant 0 : index
    %c8 = arith.constant 8 : index
    %c0_26 = arith.constant 0 : index
    %50 = vector.load %arg3[%c0_25, %c8, %c0_26] : memref<2x22x16xf32, #tpu.memory_space<vmem>>, vector<2x1x16xf32>
    %51 = vector.shape_cast %50 : vector<2x1x16xf32> to vector<2x16xf32>
    %c8_27 = arith.constant 8 : index
    %52 = memref.load %arg2[%c8_27] : memref<22xf32, #tpu.memory_space<smem>>
    %53 = vector.broadcast %52 : f32 to vector<2x16xf32>
    %54 = arith.mulf %51, %53 : vector<2x16xf32>
    %55 = arith.addf %49, %54 : vector<2x16xf32>
    %c0_28 = arith.constant 0 : index
    %c9 = arith.constant 9 : index
    %c0_29 = arith.constant 0 : index
    %56 = vector.load %arg3[%c0_28, %c9, %c0_29] : memref<2x22x16xf32, #tpu.memory_space<vmem>>, vector<2x1x16xf32>
    %57 = vector.shape_cast %56 : vector<2x1x16xf32> to vector<2x16xf32>
    %c9_30 = arith.constant 9 : index
    %58 = memref.load %arg2[%c9_30] : memref<22xf32, #tpu.memory_space<smem>>
    %59 = vector.broadcast %58 : f32 to vector<2x16xf32>
    %60 = arith.mulf %57, %59 : vector<2x16xf32>
    %61 = arith.addf %55, %60 : vector<2x16xf32>
    %c0_31 = arith.constant 0 : index
    %c10 = arith.constant 10 : index
    %c0_32 = arith.constant 0 : index
    %62 = vector.load %arg3[%c0_31, %c10, %c0_32] : memref<2x22x16xf32, #tpu.memory_space<vmem>>, vector<2x1x16xf32>
    %63 = vector.shape_cast %62 : vector<2x1x16xf32> to vector<2x16xf32>
    %c10_33 = arith.constant 10 : index
    %64 = memref.load %arg2[%c10_33] : memref<22xf32, #tpu.memory_space<smem>>
    %65 = vector.broadcast %64 : f32 to vector<2x16xf32>
    %66 = arith.mulf %63, %65 : vector<2x16xf32>
    %67 = arith.addf %61, %66 : vector<2x16xf32>
    %c0_34 = arith.constant 0 : index
    %c11 = arith.constant 11 : index
    %c0_35 = arith.constant 0 : index
    %68 = vector.load %arg3[%c0_34, %c11, %c0_35] : memref<2x22x16xf32, #tpu.memory_space<vmem>>, vector<2x1x16xf32>
    %69 = vector.shape_cast %68 : vector<2x1x16xf32> to vector<2x16xf32>
    %c11_36 = arith.constant 11 : index
    %70 = memref.load %arg2[%c11_36] : memref<22xf32, #tpu.memory_space<smem>>
    %71 = vector.broadcast %70 : f32 to vector<2x16xf32>
    %72 = arith.mulf %69, %71 : vector<2x16xf32>
    %73 = arith.addf %67, %72 : vector<2x16xf32>
    %c0_37 = arith.constant 0 : index
    %c12 = arith.constant 12 : index
    %c0_38 = arith.constant 0 : index
    %74 = vector.load %arg3[%c0_37, %c12, %c0_38] : memref<2x22x16xf32, #tpu.memory_space<vmem>>, vector<2x1x16xf32>
    %75 = vector.shape_cast %74 : vector<2x1x16xf32> to vector<2x16xf32>
    %c12_39 = arith.constant 12 : index
    %76 = memref.load %arg2[%c12_39] : memref<22xf32, #tpu.memory_space<smem>>
    %77 = vector.broadcast %76 : f32 to vector<2x16xf32>
    %78 = arith.mulf %75, %77 : vector<2x16xf32>
    %79 = arith.addf %73, %78 : vector<2x16xf32>
    %c0_40 = arith.constant 0 : index
    %c13 = arith.constant 13 : index
    %c0_41 = arith.constant 0 : index
    %80 = vector.load %arg3[%c0_40, %c13, %c0_41] : memref<2x22x16xf32, #tpu.memory_space<vmem>>, vector<2x1x16xf32>
    %81 = vector.shape_cast %80 : vector<2x1x16xf32> to vector<2x16xf32>
    %c13_42 = arith.constant 13 : index
    %82 = memref.load %arg2[%c13_42] : memref<22xf32, #tpu.memory_space<smem>>
    %83 = vector.broadcast %82 : f32 to vector<2x16xf32>
    %84 = arith.mulf %81, %83 : vector<2x16xf32>
    %85 = arith.addf %79, %84 : vector<2x16xf32>
    %c0_43 = arith.constant 0 : index
    %c14 = arith.constant 14 : index
    %c0_44 = arith.constant 0 : index
    %86 = vector.load %arg3[%c0_43, %c14, %c0_44] : memref<2x22x16xf32, #tpu.memory_space<vmem>>, vector<2x1x16xf32>
    %87 = vector.shape_cast %86 : vector<2x1x16xf32> to vector<2x16xf32>
    %c14_45 = arith.constant 14 : index
    %88 = memref.load %arg2[%c14_45] : memref<22xf32, #tpu.memory_space<smem>>
    %89 = vector.broadcast %88 : f32 to vector<2x16xf32>
    %90 = arith.mulf %87, %89 : vector<2x16xf32>
    %91 = arith.addf %85, %90 : vector<2x16xf32>
    %c0_46 = arith.constant 0 : index
    %c15 = arith.constant 15 : index
    %c0_47 = arith.constant 0 : index
    %92 = vector.load %arg3[%c0_46, %c15, %c0_47] : memref<2x22x16xf32, #tpu.memory_space<vmem>>, vector<2x1x16xf32>
    %93 = vector.shape_cast %92 : vector<2x1x16xf32> to vector<2x16xf32>
    %c15_48 = arith.constant 15 : index
    %94 = memref.load %arg2[%c15_48] : memref<22xf32, #tpu.memory_space<smem>>
    %95 = vector.broadcast %94 : f32 to vector<2x16xf32>
    %96 = arith.mulf %93, %95 : vector<2x16xf32>
    %97 = arith.addf %91, %96 : vector<2x16xf32>
    %c0_49 = arith.constant 0 : index
    %c16 = arith.constant 16 : index
    %c0_50 = arith.constant 0 : index
    %98 = vector.load %arg3[%c0_49, %c16, %c0_50] : memref<2x22x16xf32, #tpu.memory_space<vmem>>, vector<2x1x16xf32>
    %99 = vector.shape_cast %98 : vector<2x1x16xf32> to vector<2x16xf32>
    %c16_51 = arith.constant 16 : index
    %100 = memref.load %arg2[%c16_51] : memref<22xf32, #tpu.memory_space<smem>>
    %101 = vector.broadcast %100 : f32 to vector<2x16xf32>
    %102 = arith.mulf %99, %101 : vector<2x16xf32>
    %103 = arith.addf %97, %102 : vector<2x16xf32>
    %c0_52 = arith.constant 0 : index
    %c17 = arith.constant 17 : index
    %c0_53 = arith.constant 0 : index
    %104 = vector.load %arg3[%c0_52, %c17, %c0_53] : memref<2x22x16xf32, #tpu.memory_space<vmem>>, vector<2x1x16xf32>
    %105 = vector.shape_cast %104 : vector<2x1x16xf32> to vector<2x16xf32>
    %c17_54 = arith.constant 17 : index
    %106 = memref.load %arg2[%c17_54] : memref<22xf32, #tpu.memory_space<smem>>
    %107 = vector.broadcast %106 : f32 to vector<2x16xf32>
    %108 = arith.mulf %105, %107 : vector<2x16xf32>
    %109 = arith.addf %103, %108 : vector<2x16xf32>
    %c0_55 = arith.constant 0 : index
    %c18 = arith.constant 18 : index
    %c0_56 = arith.constant 0 : index
    %110 = vector.load %arg3[%c0_55, %c18, %c0_56] : memref<2x22x16xf32, #tpu.memory_space<vmem>>, vector<2x1x16xf32>
    %111 = vector.shape_cast %110 : vector<2x1x16xf32> to vector<2x16xf32>
    %c18_57 = arith.constant 18 : index
    %112 = memref.load %arg2[%c18_57] : memref<22xf32, #tpu.memory_space<smem>>
    %113 = vector.broadcast %112 : f32 to vector<2x16xf32>
    %114 = arith.mulf %111, %113 : vector<2x16xf32>
    %115 = arith.addf %109, %114 : vector<2x16xf32>
    %c0_58 = arith.constant 0 : index
    %c19 = arith.constant 19 : index
    %c0_59 = arith.constant 0 : index
    %116 = vector.load %arg3[%c0_58, %c19, %c0_59] : memref<2x22x16xf32, #tpu.memory_space<vmem>>, vector<2x1x16xf32>
    %117 = vector.shape_cast %116 : vector<2x1x16xf32> to vector<2x16xf32>
    %c19_60 = arith.constant 19 : index
    %118 = memref.load %arg2[%c19_60] : memref<22xf32, #tpu.memory_space<smem>>
    %119 = vector.broadcast %118 : f32 to vector<2x16xf32>
    %120 = arith.mulf %117, %119 : vector<2x16xf32>
    %121 = arith.addf %115, %120 : vector<2x16xf32>
    %c0_61 = arith.constant 0 : index
    %c20 = arith.constant 20 : index
    %c0_62 = arith.constant 0 : index
    %122 = vector.load %arg3[%c0_61, %c20, %c0_62] : memref<2x22x16xf32, #tpu.memory_space<vmem>>, vector<2x1x16xf32>
    %123 = vector.shape_cast %122 : vector<2x1x16xf32> to vector<2x16xf32>
    %c20_63 = arith.constant 20 : index
    %124 = memref.load %arg2[%c20_63] : memref<22xf32, #tpu.memory_space<smem>>
    %125 = vector.broadcast %124 : f32 to vector<2x16xf32>
    %126 = arith.mulf %123, %125 : vector<2x16xf32>
    %127 = arith.addf %121, %126 : vector<2x16xf32>
    %c0_64 = arith.constant 0 : index
    %c21 = arith.constant 21 : index
    %c0_65 = arith.constant 0 : index
    %128 = vector.load %arg3[%c0_64, %c21, %c0_65] : memref<2x22x16xf32, #tpu.memory_space<vmem>>, vector<2x1x16xf32>
    %129 = vector.shape_cast %128 : vector<2x1x16xf32> to vector<2x16xf32>
    %c21_66 = arith.constant 21 : index
    %130 = memref.load %arg2[%c21_66] : memref<22xf32, #tpu.memory_space<smem>>
    %131 = vector.broadcast %130 : f32 to vector<2x16xf32>
    %132 = arith.mulf %129, %131 : vector<2x16xf32>
    %133 = arith.addf %127, %132 : vector<2x16xf32>
    %c0_67 = arith.constant 0 : index
    %c0_68 = arith.constant 0 : index
    %134 = vector.load %arg4[%c0_67, %c0_68] : memref<2x16xf32, #tpu.memory_space<vmem>>, vector<2x16xf32>
    tpu.vector_store %arg4[%c0_67, %c0_68], %133 {strides = array<i32>} : memref<2x16xf32, #tpu.memory_space<vmem>>, vector<2x16xf32>,
    %cst = arith.constant dense<0.000000e+00> : vector<16xf32>
    %135 = vector.multi_reduction <add>, %133, %cst [0] : vector<2x16xf32> to vector<16xf32>
    %136 = vector.shape_cast %135 : vector<16xf32> to vector<1x16xf32>
    %137 = arith.mulf %133, %133 : vector<2x16xf32>
    %cst_69 = arith.constant dense<0.000000e+00> : vector<16xf32>
    %138 = vector.multi_reduction <add>, %137, %cst_69 [0] : vector<2x16xf32> to vector<16xf32>
    %139 = vector.shape_cast %138 : vector<16xf32> to vector<1x16xf32>
    %140 = tpu.iota {dimensions = array<i32: 0>} : vector<8x16xi32>
    %c0_70 = arith.constant 0 : index
    %c0_71 = arith.constant 0 : index
    %c0_72 = arith.constant 0 : index
    %141 = vector.load %arg5[%c0_70, %c0_71, %c0_72] : memref<1x8x16xf32, #tpu.memory_space<vmem>>, vector<1x8x16xf32>
    %142 = vector.shape_cast %141 : vector<1x8x16xf32> to vector<8x16xf32>
    %c0_i32_73 = arith.constant 0 : i32
    %143 = vector.broadcast %c0_i32_73 : i32 to vector<8x16xi32>
    %144 = arith.cmpi eq, %140, %143 : vector<8x16xi32>
    %cst_74 = arith.constant 0.000000e+00 : f32
    %145 = vector.shape_cast %136 : vector<1x16xf32> to vector<1x16xf32>
    %146 = vector.broadcast %145 : vector<1x16xf32> to vector<8x16xf32>
    %147 = vector.broadcast %cst_74 : f32 to vector<8x16xf32>
    %148 = arith.select %144, %146, %147 : vector<8x16xi1>, vector<8x16xf32>
    %149 = arith.addf %142, %148 : vector<8x16xf32>
    %c0_75 = arith.constant 0 : index
    %c0_76 = arith.constant 0 : index
    %c0_77 = arith.constant 0 : index
    %150 = vector.load %arg5[%c0_75, %c0_76, %c0_77] : memref<1x8x16xf32, #tpu.memory_space<vmem>>, vector<1x8x16xf32>
    %151 = vector.shape_cast %150 : vector<1x8x16xf32> to vector<8x16xf32>
    %152 = vector.shape_cast %149 : vector<8x16xf32> to vector<1x8x16xf32>
    tpu.vector_store %arg5[%c0_75, %c0_76, %c0_77], %152 {strides = array<i32>} : memref<1x8x16xf32, #tpu.memory_space<vmem>>, vector<1x8x16xf32>,
    %c0_78 = arith.constant 0 : index
    %c0_79 = arith.constant 0 : index
    %c0_80 = arith.constant 0 : index
    %153 = vector.load %arg6[%c0_78, %c0_79, %c0_80] : memref<1x8x16xf32, #tpu.memory_space<vmem>>, vector<1x8x16xf32>
    %154 = vector.shape_cast %153 : vector<1x8x16xf32> to vector<8x16xf32>
    %c0_i32_81 = arith.constant 0 : i32
    %155 = vector.broadcast %c0_i32_81 : i32 to vector<8x16xi32>
    %156 = arith.cmpi eq, %140, %155 : vector<8x16xi32>
    %cst_82 = arith.constant 0.000000e+00 : f32
    %157 = vector.shape_cast %139 : vector<1x16xf32> to vector<1x16xf32>
    %158 = vector.broadcast %157 : vector<1x16xf32> to vector<8x16xf32>
    %159 = vector.broadcast %cst_82 : f32 to vector<8x16xf32>
    %160 = arith.select %156, %158, %159 : vector<8x16xi1>, vector<8x16xf32>
    %161 = arith.addf %154, %160 : vector<8x16xf32>
    %c0_83 = arith.constant 0 : index
    %c0_84 = arith.constant 0 : index
    %c0_85 = arith.constant 0 : index
    %162 = vector.load %arg6[%c0_83, %c0_84, %c0_85] : memref<1x8x16xf32, #tpu.memory_space<vmem>>, vector<1x8x16xf32>
    %163 = vector.shape_cast %162 : vector<1x8x16xf32> to vector<8x16xf32>
    %164 = vector.shape_cast %161 : vector<8x16xf32> to vector<1x8x16xf32>
    tpu.vector_store %arg6[%c0_83, %c0_84, %c0_85], %164 {strides = array<i32>} : memref<1x8x16xf32, #tpu.memory_space<vmem>>, vector<1x8x16xf32>,
    return
  }
  func.func @transform_0(%arg0: i32, %arg1: i32) -> i32 {
    %c0_i32 = arith.constant 0 : i32
    %c0_i32_0 = arith.constant 0 : i32
    return %c0_i32 : i32
  }
  func.func @transform_1(%arg0: i32, %arg1: i32) -> (i32, i32, i32) {
    %c0_i32 = arith.constant 0 : i32
    %c0_i32_0 = arith.constant 0 : i32
    return %arg0, %c0_i32, %arg1 : i32, i32, i32
  }
  func.func @transform_2(%arg0: i32, %arg1: i32) -> (i32, i32) {
    %c0_i32 = arith.constant 0 : i32
    return %arg0, %arg1 : i32, i32
  }
  func.func @transform_3(%arg0: i32, %arg1: i32) -> (i32, i32, i32) {
    %c0_i32 = arith.constant 0 : i32
    %c0_i32_0 = arith.constant 0 : i32
    %c0_i32_1 = arith.constant 0 : i32
    return %arg0, %c0_i32, %c0_i32_0 : i32, i32, i32
  }
  func.func @transform_4(%arg0: i32, %arg1: i32) -> (i32, i32, i32) {
    %c0_i32 = arith.constant 0 : i32
    %c0_i32_0 = arith.constant 0 : i32
    %c0_i32_1 = arith.constant 0 : i32
    return %arg0, %c0_i32, %c0_i32_0 : i32, i32, i32
  }
}

</mosaic_0001>

<bundles_post_ra>
// kernel: tpu_custom_call.1
= control target key start
LH: loop header
LB: loop body
LE: loop exit
PB: predicated region body
PF: predicated region fallthrough
CT: control target
= control target key end

     0   :  { %10 = vsyncpa [#allocation4], 0  ;;  %s673_s0 = inlined_call_operand.vmem [shape: f32[22], index: 0, kind: input, shape index: {}]   ;;  %s674_s1 = inlined_call_operand.vmem [shape: f32[2,22,16], index: 1, kind: input, shape index: {}]   ;;  %s675_s2 = inlined_call_operand.hbm [shape: f32[2,16], index: 2, kind: output, shape index: {0}]   ;;  %s676_s3 = inlined_call_operand.hbm [shape: f32[1,8,16], index: 3, kind: output, shape index: {1}]   ;;  %s677_s4 = inlined_call_operand.hbm [shape: f32[1,8,16], index: 4, kind: output, shape index: {2}]  }
   0x1   :  { %11 = vsyncpa [#allocation3], 0 }
   0x2   :  { %12 = vsyncpa [#allocation7], 0  ;;  %s19_s17 = sshll.u32 %s673_s0, 4  ;;  %s20_s17 = int_to_ptr.vmem [resolvable:$true] %s19_s17 }
   0x3   :  { %s327_s18 = scalar_lea.vmem %s20_s17, 16  ;;  %p332_p1 = scmp.lt.s32.totalorder %s20_s17, %s20_s17 }
   0x4   :  { %p328_p0 = scmp.ne.s32.totalorder %s20_s17, %s327_s18  ;;  %p333_p2 = scmp.lt.s32.totalorder %s327_s18, %s327_s18 }
   0x6   :  { %p334_p3 = por %p333_p2, %p332_p1 }
   0x8   :  { %p335_p4 = pnand %p334_p3, %p328_p0 }
   0xa   :  { %338 = shalt.err (!%p335_p4)
}
   0xb   :  { %s411_s19 = smov [#allocation2]  }
   0xc   :  { %22 = dma.vmem_to_smem %s20_s17, 16, %s411_s19, [#allocation4]  }
   0xd   :  { %405 = dma.done.wait [#allocation4], 16  }
   0xe   :  { %406 = vsyncadd [#allocation4], 4294967280 }
   0xf   :  { %28 = sfence }
  0x10   :  { %vm33_vm0 = vcmask 130048   ;;  %v412_v0 = vmov 0.0   ;;  %s38_s0 = sld [smem:[#allocation2]]  ;;  %s301_s20 = sld [smem:[#allocation2 + $0x1]]  ;;  %v36_v1 = vld [vmem:[%s674_s1] sm:$0x1] }
  0x11   :  { %34 = vst.msk [vmem:[#allocation6] sm:$0xff] %vm33_vm0, %v412_v0  ;;  %35 = vst.msk [vmem:[#allocation8] sm:$0xff] %vm33_vm0, %v412_v0  ;;  %s302_s21 = sld [smem:[#allocation2 + $0x2]]  ;;  %s303_s22 = sld [smem:[#allocation2 + $0x3]]  ;;  %v37_v2 = vld [vmem:[%s674_s1 + $0x18] sm:$0x1] }
  0x12   :  { %s452_s27 = sld [smem:[#allocation2 + $0x4]]  ;;  %v42_v3 = vld [vmem:[%s674_s1 + $0x1] sm:$0x1]  ;;  %v43_v4 = vld [vmem:[%s674_s1 + $0x19] sm:$0x1]  ;;  %s460_s6 = sld [smem:[#allocation2 + $0x5]] }
  0x13   :  { %v50_v6 = vld [vmem:[%s674_s1 + $0x2] sm:$0x1]  ;;  %v51_v7 = vld [vmem:[%s674_s1 + $0x1a] sm:$0x1]  ;;  %s468_s11 = sld [smem:[#allocation2 + $0x6]]  ;;  %s476_s16 = sld [smem:[#allocation2 + $0x7]] }
  0x14   :  { %v58_v11 = vld [vmem:[%s674_s1 + $0x3] sm:$0x1]  ;;  %v59_v12 = vld [vmem:[%s674_s1 + $0x1b] sm:$0x1]  ;;  %v66_v19 = vld [vmem:[%s674_s1 + $0x4] sm:$0x1] }
  0x15   :  { %v67_v20 = vld [vmem:[%s674_s1 + $0x1c] sm:$0x1]  ;;  %v74_v26 = vld [vmem:[%s674_s1 + $0x5] sm:$0x1]  ;;  %v75_v27 = vld [vmem:[%s674_s1 + $0x1d] sm:$0x1] }
  0x16   :  { %v39_v5 = vstv %s38_s0  ;;  %v45_v10 = vstv %s301_s20  ;;  %s484_s20 = sld [smem:[#allocation2 + $0x8]]  ;;  %s494_s25 = sld [smem:[#allocation2 + $0x9]]  ;;  %v82_v33 = vld [vmem:[%s674_s1 + $0x6] sm:$0x1]  ;;  %v83_v34 = vld [vmem:[%s674_s1 + $0x1e] sm:$0x1] }
  0x17   :  { %v40_v8 = vmul.f32 %v39_v5, %v36_v1  ;;  %v41_v9 = vmul.f32 %v39_v5, %v37_v2  ;;  %v46_v13 = vmul.f32 %v45_v10, %v42_v3  ;;  %v47_v14 = vmul.f32 %v45_v10, %v43_v4  ;;  %s503_s30 = sld [smem:[#allocation2 + $0xa]]  ;;  %v90_v40 = vld [vmem:[%s674_s1 + $0x7] sm:$0x1]  ;;  %v91_v41 = vld [vmem:[%s674_s1 + $0x1f] sm:$0x1]  ;;  %s512_s9 = sld [smem:[#allocation2 + $0xb]] }
  0x18   :  { %v53_v15 = vstv %s302_s21  ;;  %v61_v18 = vstv %s303_s22  ;;  %v69_v25 = vstv %s452_s27  ;;  %v77_v28 = vstv %s460_s6  ;;  %s521_s14 = sld [smem:[#allocation2 + $0xc]]  ;;  %s530_s19 = sld [smem:[#allocation2 + $0xd]] }
  0x19   :  { %v54_v16 = vmul.f32 %v53_v15, %v50_v6  ;;  %v55_v17 = vmul.f32 %v53_v15, %v51_v7  ;;  %v48_v21 = vadd.f32 %v46_v13, %v40_v8  ;;  %v49_v22 = vadd.f32 %v47_v14, %v41_v9  ;;  %v98_v47 = vld [vmem:[%s674_s1 + $0x8] sm:$0x1]  ;;  %v99_v48 = vld [vmem:[%s674_s1 + $0x20] sm:$0x1]  ;;  %v106_v54 = vld [vmem:[%s674_s1 + $0x9] sm:$0x1] }
  0x1a   :  { %v62_v23 = vmul.f32 %v61_v18, %v58_v11  ;;  %v63_v24 = vmul.f32 %v61_v18, %v59_v12  ;;  %v70_v31 = vmul.f32 %v69_v25, %v66_v19  ;;  %v71_v32 = vmul.f32 %v69_v25, %v67_v20  ;;  %v107_v55 = vld [vmem:[%s674_s1 + $0x21] sm:$0x1]  ;;  %v114_v61 = vld [vmem:[%s674_s1 + $0xa] sm:$0x1]  ;;  %v115_v62 = vld [vmem:[%s674_s1 + $0x22] sm:$0x1] }
  0x1b   :  { %v56_v29 = vadd.f32 %v54_v16, %v48_v21  ;;  %v57_v30 = vadd.f32 %v55_v17, %v49_v22  ;;  %v85_v35 = vstv %s468_s11  ;;  %v78_v38 = vmul.f32 %v77_v28, %v74_v26  ;;  %s539_s22 = sld [smem:[#allocation2 + $0xe]]  ;;  %v122_v4 = vld [vmem:[%s674_s1 + $0xb] sm:$0x1]  ;;  %v123_v5 = vld [vmem:[%s674_s1 + $0x23] sm:$0x1]  ;;  %s548_s27 = sld [smem:[#allocation2 + $0xf]] }
  0x1c   :  { %v79_v39 = vmul.f32 %v77_v28, %v75_v27  ;;  %v93_v42 = vstv %s476_s16  ;;  %v86_v45 = vmul.f32 %v85_v35, %v82_v33  ;;  %v87_v46 = vmul.f32 %v85_v35, %v83_v34  ;;  %v130_v11 = vld [vmem:[%s674_s1 + $0xc] sm:$0x1]  ;;  %v131_v12 = vld [vmem:[%s674_s1 + $0x24] sm:$0x1]  ;;  %s557_s7 = sld [smem:[#allocation2 + $0x10]]  ;;  %s566_s12 = sld [smem:[#allocation2 + $0x11]] }
  0x1d   :  { %v64_v36 = vadd.f32 %v62_v23, %v56_v29  ;;  %v65_v37 = vadd.f32 %v63_v24, %v57_v30  ;;  %v101_v49 = vstv %s484_s20  ;;  %v94_v52 = vmul.f32 %v93_v42, %v90_v40  ;;  %v138_v18 = vld [vmem:[%s674_s1 + $0xd] sm:$0x1]  ;;  %v139_v19 = vld [vmem:[%s674_s1 + $0x25] sm:$0x1]  ;;  %v146_v25 = vld [vmem:[%s674_s1 + $0xe] sm:$0x1] }
  0x1e   :  { %v95_v53 = vmul.f32 %v93_v42, %v91_v41  ;;  %v109_v56 = vstv %s494_s25  ;;  %v102_v59 = vmul.f32 %v101_v49, %v98_v47  ;;  %v103_v60 = vmul.f32 %v101_v49, %v99_v48  ;;  %v147_v26 = vld [vmem:[%s674_s1 + $0x26] sm:$0x1]  ;;  %s575_s17 = sld [smem:[#allocation2 + $0x12]]  ;;  %v155_v33 = vld [vmem:[%s674_s1 + $0x27] sm:$0x1]  ;;  %s584_s21 = sld [smem:[#allocation2 + $0x13]] }
  0x1f   :  { %v72_v43 = vadd.f32 %v70_v31, %v64_v36  ;;  %v73_v44 = vadd.f32 %v71_v32, %v65_v37  ;;  %v117_v63 = vstv %s503_s30  ;;  %v110_v2 = vmul.f32 %v109_v56, %v106_v54  ;;  %v154_v32 = vld [vmem:[%s674_s1 + $0xf] sm:$0x1]  ;;  %v163_v40 = vld [vmem:[%s674_s1 + $0x28] sm:$0x1]  ;;  %s593_s26 = sld [smem:[#allocation2 + $0x14]]  ;;  %s602_s5 = sld [smem:[#allocation2 + $0x15]] }
  0x20   :  { %v111_v3 = vmul.f32 %v109_v56, %v107_v55  ;;  %v125_v6 = vstv %s512_s9  ;;  %v118_v9 = vmul.f32 %v117_v63, %v114_v61  ;;  %v119_v10 = vmul.f32 %v117_v63, %v115_v62  ;;  %v171_v47 = vld [vmem:[%s674_s1 + $0x29] sm:$0x1]  ;;  %v179_v54 = vld [vmem:[%s674_s1 + $0x2a] sm:$0x1]  ;;  %v187_v61 = vld [vmem:[%s674_s1 + $0x2b] sm:$0x1] }
  0x21   :  { %v80_v50 = vadd.f32 %v78_v38, %v72_v43  ;;  %v81_v51 = vadd.f32 %v79_v39, %v73_v44  ;;  %v133_v13 = vstv %s521_s14  ;;  %v126_v16 = vmul.f32 %v125_v6, %v122_v4  ;;  %v162_v39 = vld [vmem:[%s674_s1 + $0x10] sm:$0x1]  ;;  %v195_v4 = vld [vmem:[%s674_s1 + $0x2c] sm:$0x1] }
  0x22   :  { %v127_v17 = vmul.f32 %v125_v6, %v123_v5  ;;  %v141_v20 = vstv %s530_s19  ;;  %v134_v23 = vmul.f32 %v133_v13, %v130_v11  ;;  %v135_v24 = vmul.f32 %v133_v13, %v131_v12  ;;  %v203_v11 = vld [vmem:[%s674_s1 + $0x2d] sm:$0x1] }
  0x23   :  { %v88_v57 = vadd.f32 %v86_v45, %v80_v50  ;;  %v89_v58 = vadd.f32 %v87_v46, %v81_v51  ;;  %v149_v27 = vstv %s539_s22  ;;  %v142_v30 = vmul.f32 %v141_v20, %v138_v18  ;;  %v170_v46 = vld [vmem:[%s674_s1 + $0x11] sm:$0x1] }
  0x24   :  { %v143_v31 = vmul.f32 %v141_v20, %v139_v19  ;;  %v157_v34 = vstv %s548_s27  ;;  %v150_v37 = vmul.f32 %v149_v27, %v146_v25  ;;  %v151_v38 = vmul.f32 %v149_v27, %v147_v26 }
  0x25   :  { %v96_v0 = vadd.f32 %v94_v52, %v88_v57  ;;  %v97_v1 = vadd.f32 %v95_v53, %v89_v58  ;;  %v165_v41 = vstv %s557_s7  ;;  %v158_v44 = vmul.f32 %v157_v34, %v154_v32  ;;  %v178_v53 = vld [vmem:[%s674_s1 + $0x12] sm:$0x1] }
  0x26   :  { %v159_v45 = vmul.f32 %v157_v34, %v155_v33  ;;  %v173_v48 = vstv %s566_s12  ;;  %v166_v51 = vmul.f32 %v165_v41, %v162_v39  ;;  %v167_v52 = vmul.f32 %v165_v41, %v163_v40 }
  0x27   :  { %v104_v7 = vadd.f32 %v102_v59, %v96_v0  ;;  %v105_v8 = vadd.f32 %v103_v60, %v97_v1  ;;  %v181_v55 = vstv %s575_s17  ;;  %v174_v58 = vmul.f32 %v173_v48, %v170_v46  ;;  %v186_v60 = vld [vmem:[%s674_s1 + $0x13] sm:$0x1] }
  0x28   :  { %v175_v59 = vmul.f32 %v173_v48, %v171_v47  ;;  %v189_v62 = vstv %s584_s21  ;;  %v182_v1 = vmul.f32 %v181_v55, %v178_v53  ;;  %v197_v5 = vstv %s593_s26  ;;  %s413_s21 = smov [#allocation5]  }
  0x29   :  { %v112_v14 = vadd.f32 %v110_v2, %v104_v7  ;;  %v113_v15 = vadd.f32 %v111_v3, %v105_v8  ;;  %v183_v2 = vmul.f32 %v181_v55, %v179_v54  ;;  %v194_v3 = vld [vmem:[%s674_s1 + $0x14] sm:$0x1]  ;;  %v190_v8 = vmul.f32 %v189_v62, %v186_v60  ;;  %s265_s23 = sshll.u32 %s413_s21, 4  ;;  %s266_s23 = int_to_ptr.vmem [resolvable:$true] %s265_s23 }
  0x2a   :  { %v205_v12 = vstv %s602_s5  ;;  %vm213_vm1 = vcmask 1041409   ;;  %vm216_vm2 = vcmask 123904   ;;  %v239_v32 = vlaneseq  ;;  %p344_p6 = scmp.lt.s32.totalorder %s266_s23, %s266_s23 }
  0x2b   :  { %v120_v21 = vadd.f32 %v118_v9, %v112_v14  ;;  %v121_v22 = vadd.f32 %v119_v10, %v113_v15  ;;  %v191_v9 = vmul.f32 %v189_v62, %v187_v61  ;;  %v202_v10 = vld [vmem:[%s674_s1 + $0x15] sm:$0x1]  ;;  %v198_v15 = vmul.f32 %v197_v5, %v194_v3  ;;  %s339_s1 = scalar_lea.vmem %s266_s23, 32 }
  0x2c   :  { %v206_v19 = vmul.f32 %v205_v12, %v202_v10  ;;  %v207_v20 = vmul.f32 %v205_v12, %v203_v11  ;;  %p340_p5 = scmp.ne.s32.totalorder %s266_s23, %s339_s1  ;;  %p345_p7 = scmp.lt.s32.totalorder %s339_s1, %s339_s1 }
  0x2d   :  { %v128_v28 = vadd.f32 %v126_v16, %v120_v21  ;;  %v129_v29 = vadd.f32 %v127_v17, %v121_v22  ;;  %v199_v16 = vmul.f32 %v197_v5, %v195_v4 }
  0x2e   :  { %p346_p8 = por %p345_p7, %p344_p6 }
  0x2f   :  { %v136_v35 = vadd.f32 %v134_v23, %v128_v28  ;;  %v137_v36 = vadd.f32 %v135_v24, %v129_v29 }
  0x30   :  { %p347_p9 = pnand %p346_p8, %p340_p5 }
  0x31   :  { %v144_v42 = vadd.f32 %v142_v30, %v136_v35  ;;  %v145_v43 = vadd.f32 %v143_v31, %v137_v36 }
  0x33   :  { %v152_v49 = vadd.f32 %v150_v37, %v144_v42  ;;  %v153_v50 = vadd.f32 %v151_v38, %v145_v43 }
  0x35   :  { %v160_v56 = vadd.f32 %v158_v44, %v152_v49  ;;  %v161_v57 = vadd.f32 %v159_v45, %v153_v50 }
  0x37   :  { %v168_v63 = vadd.f32 %v166_v51, %v160_v56  ;;  %v169_v0 = vadd.f32 %v167_v52, %v161_v57 }
  0x39   :  { %v176_v6 = vadd.f32 %v174_v58, %v168_v63  ;;  %v177_v7 = vadd.f32 %v175_v59, %v169_v0 }
  0x3b   :  { %v184_v13 = vadd.f32 %v182_v1, %v176_v6  ;;  %v185_v14 = vadd.f32 %v183_v2, %v177_v7 }
  0x3d   :  { %v192_v17 = vadd.f32 %v190_v8, %v184_v13  ;;  %v193_v18 = vadd.f32 %v191_v9, %v185_v14 }
  0x3f   :  { %v200_v21 = vadd.f32 %v198_v15, %v192_v17  ;;  %v201_v22 = vadd.f32 %v199_v16, %v193_v18 }
  0x41   :  { %v208_v23 = vadd.f32 %v206_v19, %v200_v21  ;;  %v209_v24 = vadd.f32 %v207_v20, %v201_v22 }
  0x43   :  { %v212_v25 = vrot.slane %v209_v24, 7  ;;  %v225_v26 = vmul.f32 %v208_v23, %v208_v23  ;;  %v226_v27 = vmul.f32 %v209_v24, %v209_v24 }
  0x45   :  { %v214_v28 = vsel %vm213_vm1, %v212_v25, %v208_v23  ;;  %v229_v29 = vrot.slane %v226_v27, 7 }
  0x46   :  { %v218_v30 = vsel %vm216_vm2, %v214_v28, 0.0  ;;  %217 = vst.msk [vmem:[#allocation5] sm:$0x3] %vm216_vm2, %v214_v28 }
  0x47   :  { %v219_v31 = vrot.slane %v218_v30, 4  ;;  %v230_v33 = vsel %vm213_vm1, %v229_v29, %v225_v26 }
  0x48   :  { %350 = shalt.err (!%p347_p9)
}
  0x49   :  { %s351_s25 = scalar_lea.hbm %s675_s2, 32 }
  0x4a   :  { %p352_p10 = scmp.ne.s32.totalorder %s675_s2, %s351_s25  ;;  %p355_p11 = scmp.lt.u32.totalorder %s351_s25, %s675_s2 }
  0x4c   :  { %p357_p12 = pnand %p355_p11, %p352_p10 }
  0x4e   :  { %360 = shalt.err (!%p357_p12)
}
  0x4f   :  { %268 = dma.vmem_to_hbm [thread:$0]  %s266_s23, 32, %s675_s2, [#allocation3]   ;;  %v232_v34 = vsel %vm216_vm2, %v230_v33, 0.0  ;;  %v220_v35 = vadd.f32 %v219_v31, %v218_v30  ;;  %v240_v38 = vshrl.u32 %v239_v32, 7  ;;  %v241_v47 = vld [vmem:[#allocation6] sm:$0xff]  ;;  %v251_v51 = vld [vmem:[#allocation8] sm:$0xff] }
  0x50   :  { %v233_v36 = vrot.slane %v232_v34, 4  ;;  %s414_s6 = smov [#allocation6]   ;;  %s415_s7 = smov [#allocation8]  }
  0x51   :  { %v221_v37 = vrot.slane %v220_v35, 2  ;;  %v245_v43 = vsub.s32 0, %v240_v38  ;;  %vm242_vm3 = vcmp.eq.s32.totalorder %v240_v38, 0  ;;  %s275_s2 = sshll.u32 %s414_s6, 4  ;;  %s285_s8 = sshll.u32 %s415_s7, 4  ;;  %s276_s2 = int_to_ptr.vmem [resolvable:$true] %s275_s2  ;;  %s286_s8 = int_to_ptr.vmem [resolvable:$true] %s285_s8 }
  0x52   :  { %v234_v39 = vadd.f32 %v233_v36, %v232_v34  ;;  %s361_s9 = scalar_lea.vmem %s276_s2, 128  ;;  %p366_p0 = scmp.lt.s32.totalorder %s276_s2, %s276_s2 }
  0x53   :  { %v222_v40 = vadd.f32 %v221_v37, %v220_v35  ;;  %p362_p13 = scmp.ne.s32.totalorder %s276_s2, %s361_s9  ;;  %p367_p1 = scmp.lt.s32.totalorder %s361_s9, %s361_s9 }
  0x54   :  { %v235_v41 = vrot.slane %v234_v39, 2 }
  0x55   :  { %v223_v42 = vrot.slane %v222_v40, 1  ;;  %p368_p2 = por %p367_p1, %p366_p0 }
  0x56   :  { %v236_v44 = vadd.f32 %v235_v41, %v234_v39 }
  0x57   :  { %v224_v45 = vadd.f32 %v223_v42, %v222_v40  ;;  %p369_p3 = pnand %p368_p2, %p362_p13 }
  0x58   :  { %v237_v46 = vrot.slane %v236_v44, 1 }
  0x59   :  { %v246_v48 = vrot.slane %v224_v45, %v245_v43 }
  0x5a   :  { %v238_v49 = vadd.f32 %v237_v46, %v236_v44 }
  0x5b   :  { %v247_v50 = vsel %vm242_vm3, %v246_v48, 0.0 }
  0x5c   :  { %v255_v52 = vrot.slane %v238_v49, %v245_v43  ;;  %v248_v53 = vadd.f32 %v247_v50, %v241_v47 }
  0x5e   :  { %v256_v54 = vsel %vm242_vm3, %v255_v52, 0.0  ;;  %250 = vst.msk [vmem:[#allocation6] sm:$0xff] %vm33_vm0, %v248_v53 }
  0x5f   :  { %v257_v55 = vadd.f32 %v256_v54, %v251_v51 }
  0x60   :  { %372 = shalt.err (!%p369_p3)
}
  0x61   :  { %s373_s12 = scalar_lea.hbm %s676_s3, 128 }
  0x62   :  { %p374_p4 = scmp.ne.s32.totalorder %s676_s3, %s373_s12  ;;  %p377_p5 = scmp.lt.u32.totalorder %s373_s12, %s676_s3 }
  0x64   :  { %p379_p6 = pnand %p377_p5, %p374_p4 }
  0x66   :  { %382 = shalt.err (!%p379_p6)
}
  0x67   :  { %278 = dma.vmem_to_hbm [thread:$0]  %s276_s2, 128, %s676_s3, [#allocation7]   ;;  %258 = vst.msk [vmem:[#allocation8] sm:$0xff] %vm33_vm0, %v257_v55 }
  0x68   :  { %s383_s19 = scalar_lea.vmem %s286_s8, 128  ;;  %p388_p8 = scmp.lt.s32.totalorder %s286_s8, %s286_s8 }
  0x69   :  { %p384_p7 = scmp.ne.s32.totalorder %s286_s8, %s383_s19  ;;  %p389_p9 = scmp.lt.s32.totalorder %s383_s19, %s383_s19 }
  0x6b   :  { %p390_p10 = por %p389_p9, %p388_p8 }
  0x6d   :  { %p391_p11 = pnand %p390_p10, %p384_p7 }
  0x6f   :  { %394 = shalt.err (!%p391_p11)
}
  0x70   :  { %s395_s21 = scalar_lea.hbm %s677_s4, 128 }
  0x71   :  { %p396_p12 = scmp.ne.s32.totalorder %s677_s4, %s395_s21  ;;  %p399_p13 = scmp.lt.u32.totalorder %s395_s21, %s677_s4 }
  0x73   :  { %p401_p0 = pnand %p399_p13, %p396_p12 }
  0x75   :  { %404 = shalt.err (!%p401_p0)
}
  0x76   :  { %288 = dma.vmem_to_hbm [thread:$0]  %s286_s8, 128, %s677_s4, [#allocation7]  }
  0x77   :  { %407 = dma.done.wait [#allocation3], 32  }
  0x78   :  { %408 = vsyncadd [#allocation3], 4294967264 }
  0x79   :  { %409 = dma.done.wait [#allocation7], 256  }
  0x7a   :  { %410 = vsyncadd [#allocation7], 4294967040 }
  0x7b   :  { %298 = vsyncpa [#allocation3], 1 }
  0x7c   :  { %299 = vsyncpa [#allocation7], 1 }
  0x7d   :  { %300 = vsyncpa [#allocation4], 1 }

</bundles_post_ra>
